<compile_context>
chip_gen: v6e
topology: v6e:2x2x1
jax: 0.10.0
libtpu: 0.0.40
codegen_flags: <defaults>
</compile_context>

<pallas_src>
import jax
import jax.numpy as jnp
from jax.experimental import pallas as pl
from jax.experimental.pallas import tpu as pltpu


# ----------------------------------------------------------------------------
# In-kernel helpers
# ----------------------------------------------------------------------------
def _sel_rows(h_out, h_in, stride, dh):
    """(h_out, h_in) 0/1 matrix with R[i, r] = 1 iff r == stride*i + dh - 1.

    Encodes the vertical conv tap, the stride and the zero padding in H
    (rows with no match are all-zero -> contribute the zero pad)."""
    r = jax.lax.broadcasted_iota(jnp.int32, (h_out, h_in), 0)
    c = jax.lax.broadcasted_iota(jnp.int32, (h_out, h_in), 1)
    return jnp.where(c == stride * r + (dh - 1), 1.0, 0.0).astype(jnp.bfloat16)


def _conv3x3_rows(a, w_ref, h_out, stride):
    """3x3 conv (padding=1, given stride) on a row-major (H, W*Cin) activation.

    a:      (h_in, w_in*cin) float32
    w_ref:  (3, w_in*cin, w_out*cout) bf16 banded weights (one slab per dh)
    returns (h_out, w_out*cout) float32
    """
    h_in = a.shape[0]
    ab = a.astype(jnp.bfloat16)
    acc = None
    for dh in range(3):
        if stride == 1 and dh == 1:
            rows = ab                                   # center tap: identity
        else:
            sel = _sel_rows(h_out, h_in, stride, dh)
            rows = jnp.dot(sel, ab,
                           preferred_element_type=jnp.float32
                           ).astype(jnp.bfloat16)
        part = jnp.dot(rows, w_ref[dh], preferred_element_type=jnp.float32)
        acc = part if acc is None else acc + part
    return acc


# ----------------------------------------------------------------------------
# Pallas kernels
# ----------------------------------------------------------------------------
def _stem_kernel(x_ref, w_ref, b_ref, o_ref):
    x = x_ref[0]                                            # (H, W*Cin) f32
    o_ref[0] = _conv3x3_rows(x, w_ref, x_ref.shape[1], 1) + b_ref[...]


def _block_kernel_identity(x_ref, s1, t1, w1, b1, s2, t2, w2, b2, o_ref):
    """wide_basic with identity shortcut (stride 1, cin == cout)."""
    h_in = x_ref.shape[1]
    h_out = o_ref.shape[1]
    stride = h_in // h_out
    x = x_ref[0]                                            # (H, W*Cin) f32
    a1 = jnp.maximum(x * s1[...] + t1[...], 0.0)            # relu(bn1(x))
    m = _conv3x3_rows(a1, w1, h_in, 1) + b1[...]            # conv1 (+bias)
    # dropout: eval-mode identity
    a2 = jnp.maximum(m * s2[...] + t2[...], 0.0)            # relu(bn2(.))
    out = _conv3x3_rows(a2, w2, h_out, stride) + b2[...]    # conv2 (+bias)
    o_ref[0] = out + x                                      # residual add


def _block_kernel_shortcut(x_ref, s1, t1, w1, b1, s2, t2, w2, b2,
                           wsc, bsc, o_ref):
    """wide_basic with 1x1 strided conv shortcut (all fused)."""
    h_in = x_ref.shape[1]
    h_out = o_ref.shape[1]
    stride = h_in // h_out
    x = x_ref[0]
    a1 = jnp.maximum(x * s1[...] + t1[...], 0.0)
    m = _conv3x3_rows(a1, w1, h_in, 1) + b1[...]
    a2 = jnp.maximum(m * s2[...] + t2[...], 0.0)
    out = _conv3x3_rows(a2, w2, h_out, stride) + b2[...]
    # 1x1 shortcut conv with stride (row selection r == stride*i <=> dh == 1)
    sel = _sel_rows(h_out, h_in, stride, 1)
    xs = jnp.dot(sel, x.astype(jnp.bfloat16),
                 preferred_element_type=jnp.float32).astype(jnp.bfloat16)
    sc = jnp.dot(xs, wsc[...], preferred_element_type=jnp.float32) + bsc[...]
    o_ref[0] = out + sc


def _head_kernel(x_ref, s_ref, t_ref, w_ref, b_ref, o_ref):
    """relu(bn_final(x)) -> avg_pool2d(8) -> Linear, both images in one call.

    The sum over W and the 1/(H*W) and the Linear weight are folded into
    w_ref (512, num_classes); the kernel only sums over H."""
    n = x_ref.shape[0]
    rows = []
    for b in range(n):
        a = jnp.maximum(x_ref[b] * s_ref[...] + t_ref[...], 0.0)   # (H, W*C)
        pooled = jnp.sum(a, axis=0, keepdims=True)                 # (1, W*C)
        rows.append(jnp.dot(pooled, w_ref[...],
                            preferred_element_type=jnp.float32) + b_ref[...])
    o_ref[...] = jnp.concatenate(rows, axis=0)


# ----------------------------------------------------------------------------
# pallas_call wrappers
# ----------------------------------------------------------------------------
_CPARAMS = pltpu.CompilerParams(dimension_semantics=("parallel",),
                                vmem_limit_bytes=32 * 1024 * 1024)


def run_stem(x, w_big, b_big):
    n, h, kin = x.shape
    kout = b_big.shape[1]
    return pl.pallas_call(
        _stem_kernel,
        out_shape=jax.ShapeDtypeStruct((n, h, kout), jnp.float32),
        grid=(n,),
        in_specs=[
            pl.BlockSpec((1, h, kin), lambda b: (b, 0, 0)),
            pl.BlockSpec(w_big.shape, lambda b: (0, 0, 0)),
            pl.BlockSpec((1, kout), lambda b: (0, 0)),
        ],
        out_specs=pl.BlockSpec((1, h, kout), lambda b: (b, 0, 0)),
        compiler_params=_CPARAMS,
    )(x, w_big, b_big)


def run_block(x, p):
    n, h_in, kin = x.shape
    h_out = h_in // p["stride"]
    kmid = p["b1"].shape[1]
    kout = p["b2"].shape[1]

    def vec(k):
        return pl.BlockSpec((1, k), lambda b: (0, 0))

    in_specs = [
        pl.BlockSpec((1, h_in, kin), lambda b: (b, 0, 0)),
        vec(kin), vec(kin),
        pl.BlockSpec((3, kin, kmid), lambda b: (0, 0, 0)), vec(kmid),
        vec(kmid), vec(kmid),
        pl.BlockSpec((3, kmid, kout), lambda b: (0, 0, 0)), vec(kout),
    ]
    args = [x, p["s1"], p["t1"], p["w1"], p["b1"],
            p["s2"], p["t2"], p["w2"], p["b2"]]
    kernel = _block_kernel_identity
    if p["has_shortcut"]:
        in_specs += [pl.BlockSpec((kin, kout), lambda b: (0, 0)), vec(kout)]
        args += [p["wsc"], p["bsc"]]
        kernel = _block_kernel_shortcut

    return pl.pallas_call(
        kernel,
        out_shape=jax.ShapeDtypeStruct((n, h_out, kout), jnp.float32),
        grid=(n,),
        in_specs=in_specs,
        out_specs=pl.BlockSpec((1, h_out, kout), lambda b: (b, 0, 0)),
        compiler_params=_CPARAMS,
    )(*args)


def run_head(x, s, t, w, b):
    n = x.shape[0]
    ncls = b.shape[1]
    return pl.pallas_call(
        _head_kernel,
        out_shape=jax.ShapeDtypeStruct((n, ncls), jnp.float32),
    )(x, s, t, w, b)


# ----------------------------------------------------------------------------
# Host-side weight preparation (banded conv matrices, folded BN, tiled bias)
# ----------------------------------------------------------------------------
def _tile_w(v, w):
    """(c,) per-channel vector -> (1, w*c) row matching the (H, W*C) layout."""
    return jnp.tile(v, w).reshape(1, -1)


def _big_conv3x3(w_hwio, w_in, stride):
    """Banded (3, W_in*Cin, W_out*Cout) bf16 slabs, one per kernel row dh."""
    cin, cout = w_hwio.shape[2], w_hwio.shape[3]
    w_out = w_in // stride
    out_cols = stride * jnp.arange(w_out)
    rows = jnp.arange(w_in)[:, None]
    slabs = []
    for dh in range(3):
        acc = jnp.zeros((w_in * cin, w_out * cout), jnp.float32)
        for dw in range(3):
            tap_src = out_cols + dw - 1                     # input col per out col
            sel = ((rows == tap_src[None, :]) &
                   (tap_src[None, :] >= 0) & (tap_src[None, :] < w_in))
            acc = acc + jnp.kron(sel.astype(jnp.float32), w_hwio[dh, dw])
        slabs.append(acc)
    return jnp.stack(slabs).astype(jnp.bfloat16)


def _big_conv1x1(w_io, w_in, stride):
    w_out = w_in // stride
    sel = (jnp.arange(w_in)[:, None] == (stride * jnp.arange(w_out))[None, :])
    return jnp.kron(sel.astype(jnp.float32), w_io).astype(jnp.bfloat16)


# ----------------------------------------------------------------------------
# Synthetic parameters (deterministic) mirroring the PyTorch module
# ----------------------------------------------------------------------------
def _make_conv(key, kh, kw, cin, cout):
    k1, k2 = jax.random.split(key)
    fan_in = kh * kw * cin
    w = jax.random.normal(k1, (kh, kw, cin, cout), jnp.float32) / jnp.sqrt(fan_in)
    b = 0.01 * jax.random.normal(k2, (cout,), jnp.float32)
    return w, b


def _make_bn(key, c, eps=1e-5):
    k1, k2, k3, k4 = jax.random.split(key, 4)
    gamma = 1.0 + 0.05 * jax.random.normal(k1, (c,), jnp.float32)
    beta = 0.05 * jax.random.normal(k2, (c,), jnp.float32)
    rmean = 0.05 * jax.random.normal(k3, (c,), jnp.float32)
    rvar = 1.0 + 0.05 * jnp.abs(jax.random.normal(k4, (c,), jnp.float32))
    scale = gamma / jnp.sqrt(rvar + eps)        # eval-mode BN folded
    shift = beta - rmean * scale
    return scale, shift


def make_wide_resnet_params(key, depth=10, widen_factor=1,
                            num_classes=10, in_chan=3):
    assert (depth - 4) % 6 == 0, "Wide-resnet depth should be 6n+4"
    n_blocks = (depth - 4) // 6
    k = widen_factor
    n_stages = [16, 16 * k, 32 * k, 64 * k]
    keys = jax.random.split(key, 6)
    params = {"conv1": _make_conv(keys[0], 3, 3, in_chan, n_stages[0])}
    in_planes = n_stages[0]
    blocks = []
    for li, (planes, stride0) in enumerate(
            [(n_stages[1], 1), (n_stages[2], 2), (n_stages[3], 2)]):
        strides = [stride0] + [1] * (n_blocks - 1)
        for bi, s in enumerate(strides):
            ks = jax.random.split(jax.random.fold_in(keys[1 + li], bi), 5)
            blk = {
                "bn1": _make_bn(ks[0], in_planes),
                "conv1": _make_conv(ks[1], 3, 3, in_planes, planes),
                "bn2": _make_bn(ks[2], planes),
                "conv2": _make_conv(ks[3], 3, 3, planes, planes),
                "stride": s,
            }
            if s != 1 or in_planes != planes:
                k1, k2 = jax.random.split(ks[4])
                wsc = (jax.random.normal(k1, (in_planes, planes), jnp.float32)
                       / jnp.sqrt(in_planes))
                bsc = 0.01 * jax.random.normal(k2, (planes,), jnp.float32)
                blk["shortcut"] = (wsc, bsc)
            blocks.append(blk)
            in_planes = planes
    params["blocks"] = blocks
    params["bn_final"] = _make_bn(keys[4], n_stages[3])
    kw_, kb_ = jax.random.split(keys[5])
    params["linear"] = (
        jax.random.normal(kw_, (n_stages[3], num_classes), jnp.float32)
        / jnp.sqrt(n_stages[3]),
        0.01 * jax.random.normal(kb_, (num_classes,), jnp.float32))
    return params


def prepare_params(params, w=32):
    prep = {
        "stem_w": _big_conv3x3(params["conv1"][0], w, 1),
        "stem_b": _tile_w(params["conv1"][1], w),
    }
    blocks = []
    w_cur = w
    for blk in params["blocks"]:
        s = blk["stride"]
        w_out = w_cur // s
        p = {
            "s1": _tile_w(blk["bn1"][0], w_cur),
            "t1": _tile_w(blk["bn1"][1], w_cur),
            "w1": _big_conv3x3(blk["conv1"][0], w_cur, 1),
            "b1": _tile_w(blk["conv1"][1], w_cur),
            "s2": _tile_w(blk["bn2"][0], w_cur),
            "t2": _tile_w(blk["bn2"][1], w_cur),
            "w2": _big_conv3x3(blk["conv2"][0], w_cur, s),
            "b2": _tile_w(blk["conv2"][1], w_out),
            "stride": s,
            "has_shortcut": "shortcut" in blk,
        }
        if p["has_shortcut"]:
            p["wsc"] = _big_conv1x1(blk["shortcut"][0], w_cur, s)
            p["bsc"] = _tile_w(blk["shortcut"][1], w_out)
        blocks.append(p)
        w_cur = w_out
    prep["blocks"] = blocks
    prep["head_s"] = _tile_w(params["bn_final"][0], w_cur)
    prep["head_t"] = _tile_w(params["bn_final"][1], w_cur)
    # avg_pool2d(., 8).view + Linear folded into one (W*C, num_classes) matrix:
    # replication over W performs the sum over w; the in-kernel sum handles h;
    # 1/(H*W) is folded in.
    prep["head_w"] = (jnp.kron(jnp.ones((w_cur, 1), jnp.float32),
                               params["linear"][0])
                      / float(w_cur * w_cur))
    prep["head_b"] = params["linear"][1].reshape(1, -1)
    return prep


# ----------------------------------------------------------------------------
# Forward pass
# ----------------------------------------------------------------------------
def wide_resnet_forward(prep, x_nchw):
    n, c, h, w = x_nchw.shape
    x = jnp.transpose(x_nchw, (0, 2, 3, 1)).astype(jnp.float32)   # NCHW -> NHWC
    x = x.reshape(n, h, w * c)                                    # (N, H, W*C)
    out = run_stem(x, prep["stem_w"], prep["stem_b"])
    for blk in prep["blocks"]:
        out = run_block(out, blk)
    return run_head(out, prep["head_s"], prep["head_t"],
                    prep["head_w"], prep["head_b"])


if __name__ == "__main__":
    key = jax.random.PRNGKey(0)
    k_param, k_in = jax.random.split(key)

    # Wide-ResNet 10x1: input must be 32x32 so avg_pool2d(., 8) yields 1x1.
    params = make_wide_resnet_params(k_param, depth=10, widen_factor=1,
                                     num_classes=10, in_chan=3)
    prep = prepare_params(params, w=32)
    x = jax.random.normal(k_in, (2, 3, 32, 32), jnp.float32)   # NCHW like PyTorch

    logits = wide_resnet_forward(prep, x)
    jax.block_until_ready(logits)
    assert logits.shape == (2, 10) and logits.dtype == jnp.float32
    print("KERNEL_OK")
</pallas_src>

<mosaic_0001>
module attributes {stable_mosaic.version = 11 : i64} {
  func.func @_stem_kernel(%arg0: i32, %arg1: memref<1x32x96xf32, #tpu.memory_space<vmem>>, %arg2: memref<3x96x512xbf16, #tpu.memory_space<vmem>>, %arg3: memref<1x512xf32, #tpu.memory_space<vmem>>, %arg4: memref<1x32x512xf32, #tpu.memory_space<vmem>>) attributes {dimension_semantics = [#tpu.dimension_semantics<parallel>], iteration_bounds = array<i64: 2>, scalar_prefetch = 0 : i64, scratch_operands = 0 : i64, tpu.core_type = #tpu.core_type<tc>, window_params = [{transform_indices = @transform_0, window_bounds = array<i64: 1, 32, 96>}, {pipeline_mode = #tpu.pipeline_mode<synchronous>, transform_indices = @transform_1, window_bounds = array<i64: 3, 96, 512>}, {pipeline_mode = #tpu.pipeline_mode<synchronous>, transform_indices = @transform_2, window_bounds = array<i64: 1, 512>}, {transform_indices = @transform_3, window_bounds = array<i64: 1, 32, 512>}]} {
    %c0 = arith.constant 0 : index
    %c0_0 = arith.constant 0 : index
    %c0_1 = arith.constant 0 : index
    %0 = vector.load %arg1[%c0, %c0_0, %c0_1] : memref<1x32x96xf32, #tpu.memory_space<vmem>>, vector<1x32x96xf32>
    %1 = vector.shape_cast %0 : vector<1x32x96xf32> to vector<32x96xf32>
    %2 = arith.truncf %1 : vector<32x96xf32> to vector<32x96xbf16>
    %3 = tpu.iota {dimensions = array<i32: 0>} : vector<32x32xi32>
    %4 = tpu.iota {dimensions = array<i32: 1>} : vector<32x32xi32>
    %c1_i32 = arith.constant 1 : i32
    %5 = vector.broadcast %c1_i32 : i32 to vector<32x32xi32>
    %6 = arith.muli %5, %3 : vector<32x32xi32>
    %c-1_i32 = arith.constant -1 : i32
    %7 = vector.broadcast %c-1_i32 : i32 to vector<32x32xi32>
    %8 = arith.addi %6, %7 : vector<32x32xi32>
    %9 = arith.cmpi eq, %4, %8 : vector<32x32xi32>
    %cst = arith.constant 1.000000e+00 : f32
    %cst_2 = arith.constant 0.000000e+00 : f32
    %10 = vector.broadcast %cst : f32 to vector<32x32xf32>
    %11 = vector.broadcast %cst_2 : f32 to vector<32x32xf32>
    %12 = arith.select %9, %10, %11 : vector<32x32xi1>, vector<32x32xf32>
    %13 = arith.truncf %12 : vector<32x32xf32> to vector<32x32xbf16>
    %cst_3 = arith.constant dense<0.000000e+00> : vector<32x96xf32>
    %14 = tpu.matmul %13, %2, %cst_3 {dimension_numbers = #tpu.dot_dimension_numbers<[1], [0], [0], [1], [0, 0, 1, 1], [], []>} : vector<32x32xbf16>, vector<32x96xbf16>, vector<32x96xf32> -> vector<32x96xf32>
    %15 = arith.truncf %14 : vector<32x96xf32> to vector<32x96xbf16>
    %c0_4 = arith.constant 0 : index
    %c0_5 = arith.constant 0 : index
    %c0_6 = arith.constant 0 : index
    %16 = vector.load %arg2[%c0_4, %c0_5, %c0_6] : memref<3x96x512xbf16, #tpu.memory_space<vmem>>, vector<1x96x512xbf16>
    %17 = vector.shape_cast %16 : vector<1x96x512xbf16> to vector<96x512xbf16>
    %cst_7 = arith.constant dense<0.000000e+00> : vector<32x512xf32>
    %18 = tpu.matmul %15, %17, %cst_7 {dimension_numbers = #tpu.dot_dimension_numbers<[1], [0], [0], [1], [0, 0, 1, 1], [], []>} : vector<32x96xbf16>, vector<96x512xbf16>, vector<32x512xf32> -> vector<32x512xf32>
    %c1 = arith.constant 1 : index
    %c0_8 = arith.constant 0 : index
    %c0_9 = arith.constant 0 : index
    %19 = vector.load %arg2[%c1, %c0_8, %c0_9] : memref<3x96x512xbf16, #tpu.memory_space<vmem>>, vector<1x96x512xbf16>
    %20 = vector.shape_cast %19 : vector<1x96x512xbf16> to vector<96x512xbf16>
    %cst_10 = arith.constant dense<0.000000e+00> : vector<32x512xf32>
    %21 = tpu.matmul %2, %20, %cst_10 {dimension_numbers = #tpu.dot_dimension_numbers<[1], [0], [0], [1], [0, 0, 1, 1], [], []>} : vector<32x96xbf16>, vector<96x512xbf16>, vector<32x512xf32> -> vector<32x512xf32>
    %22 = arith.addf %18, %21 : vector<32x512xf32>
    %23 = tpu.iota {dimensions = array<i32: 0>} : vector<32x32xi32>
    %24 = tpu.iota {dimensions = array<i32: 1>} : vector<32x32xi32>
    %c1_i32_11 = arith.constant 1 : i32
    %25 = vector.broadcast %c1_i32_11 : i32 to vector<32x32xi32>
    %26 = arith.muli %25, %23 : vector<32x32xi32>
    %c1_i32_12 = arith.constant 1 : i32
    %27 = vector.broadcast %c1_i32_12 : i32 to vector<32x32xi32>
    %28 = arith.addi %26, %27 : vector<32x32xi32>
    %29 = arith.cmpi eq, %24, %28 : vector<32x32xi32>
    %cst_13 = arith.constant 1.000000e+00 : f32
    %cst_14 = arith.constant 0.000000e+00 : f32
    %30 = vector.broadcast %cst_13 : f32 to vector<32x32xf32>
    %31 = vector.broadcast %cst_14 : f32 to vector<32x32xf32>
    %32 = arith.select %29, %30, %31 : vector<32x32xi1>, vector<32x32xf32>
    %33 = arith.truncf %32 : vector<32x32xf32> to vector<32x32xbf16>
    %cst_15 = arith.constant dense<0.000000e+00> : vector<32x96xf32>
    %34 = tpu.matmul %33, %2, %cst_15 {dimension_numbers = #tpu.dot_dimension_numbers<[1], [0], [0], [1], [0, 0, 1, 1], [], []>} : vector<32x32xbf16>, vector<32x96xbf16>, vector<32x96xf32> -> vector<32x96xf32>
    %35 = arith.truncf %34 : vector<32x96xf32> to vector<32x96xbf16>
    %c2 = arith.constant 2 : index
    %c0_16 = arith.constant 0 : index
    %c0_17 = arith.constant 0 : index
    %36 = vector.load %arg2[%c2, %c0_16, %c0_17] : memref<3x96x512xbf16, #tpu.memory_space<vmem>>, vector<1x96x512xbf16>
    %37 = vector.shape_cast %36 : vector<1x96x512xbf16> to vector<96x512xbf16>
    %cst_18 = arith.constant dense<0.000000e+00> : vector<32x512xf32>
    %38 = tpu.matmul %35, %37, %cst_18 {dimension_numbers = #tpu.dot_dimension_numbers<[1], [0], [0], [1], [0, 0, 1, 1], [], []>} : vector<32x96xbf16>, vector<96x512xbf16>, vector<32x512xf32> -> vector<32x512xf32>
    %39 = arith.addf %22, %38 : vector<32x512xf32>
    %c0_19 = arith.constant 0 : index
    %c0_20 = arith.constant 0 : index
    %40 = vector.load %arg3[%c0_19, %c0_20] : memref<1x512xf32, #tpu.memory_space<vmem>>, vector<1x512xf32>
    %41 = vector.broadcast %40 : vector<1x512xf32> to vector<32x512xf32>
    %42 = arith.addf %39, %41 : vector<32x512xf32>
    %c0_21 = arith.constant 0 : index
    %c0_22 = arith.constant 0 : index
    %c0_23 = arith.constant 0 : index
    %43 = vector.load %arg4[%c0_21, %c0_22, %c0_23] : memref<1x32x512xf32, #tpu.memory_space<vmem>>, vector<1x32x512xf32>
    %44 = vector.shape_cast %43 : vector<1x32x512xf32> to vector<32x512xf32>
    %45 = vector.shape_cast %42 : vector<32x512xf32> to vector<1x32x512xf32>
    tpu.vector_store %arg4[%c0_21, %c0_22, %c0_23], %45 {strides = array<i32>} : memref<1x32x512xf32, #tpu.memory_space<vmem>>, vector<1x32x512xf32>,
    return
  }
  func.func @transform_0(%arg0: i32) -> (i32, i32, i32) {
    %c0_i32 = arith.constant 0 : i32
    %c0_i32_0 = arith.constant 0 : i32
    %c0_i32_1 = arith.constant 0 : i32
    return %arg0, %c0_i32, %c0_i32_0 : i32, i32, i32
  }
  func.func @transform_1(%arg0: i32) -> (i32, i32, i32) {
    %c0_i32 = arith.constant 0 : i32
    %c0_i32_0 = arith.constant 0 : i32
    %c0_i32_1 = arith.constant 0 : i32
    %c0_i32_2 = arith.constant 0 : i32
    return %c0_i32, %c0_i32_0, %c0_i32_1 : i32, i32, i32
  }
  func.func @transform_2(%arg0: i32) -> (i32, i32) {
    %c0_i32 = arith.constant 0 : i32
    %c0_i32_0 = arith.constant 0 : i32
    %c0_i32_1 = arith.constant 0 : i32
    return %c0_i32, %c0_i32_0 : i32, i32
  }
  func.func @transform_3(%arg0: i32) -> (i32, i32, i32) {
    %c0_i32 = arith.constant 0 : i32
    %c0_i32_0 = arith.constant 0 : i32
    %c0_i32_1 = arith.constant 0 : i32
    return %arg0, %c0_i32, %c0_i32_0 : i32, i32, i32
  }
}

</mosaic_0001>

<bundles_post_ra>
// kernel: tpu_custom_call.1
= control target key start
LH: loop header
LB: loop body
LE: loop exit
PB: predicated region body
PF: predicated region fallthrough
CT: control target
= control target key end

     0   :  { %8 = vsyncpa [#allocation3], 0  ;;  %s2167_s0 = inlined_call_operand.hbm [shape: f32[2,32,96], index: 0, kind: input, shape index: {}]   ;;  %s2168_s1 = inlined_call_operand.hbm [shape: bf16[3,96,512], index: 1, kind: input, shape index: {}]   ;;  %s2169_s2 = inlined_call_operand.hbm [shape: f32[1,512], index: 2, kind: input, shape index: {}]   ;;  %s2170_s3 = inlined_call_operand.hbm [shape: f32[2,32,512], index: 3, kind: output, shape index: {}]  }
   0x1   :  { %10 = vsyncpa [#allocation3 + $0x1], 0 }
   0x2   :  { %11 = vsyncpa [#allocation6], 0 }
   0x3   :  { %12 = vsyncpa [#allocation4], 0 }
   0x4   :  { %14 = vsyncpa [#allocation4 + $0x1], 0  ;;  %s1817_s12 = smov 0   ;;  %s1819_s13 = smov 0  }
   0x5   :  { %s1821_s14 = smov 0   ;;  %s1823_s15 = smov 0  }
   0x6 LB: > { %s1838_s16 = sadd.s32 4294967295, %s1783_s15   ;;  %s1320_s17 = sadd.s32 4294967294, %s1783_s15   ;;  %s1783_s15 = sphi %s1823_s15, %s2192_s15   ;;  %s1779_s14 = sphi %s1821_s14, %s2191_s14   ;;  %s1775_s13 = sphi %s1819_s13, %s2190_s13   ;;  %s1771_s12 = sphi %s1817_s12, %s2189_s12  }
   0x7   : > { %p40_p0 = scmp.ne.s32.totalorder %s1775_s13, %s1771_s12  ;;  %p2171_p1 = scmp.eq.s32.totalorder %s1838_s16, 0 }
   0x8   : > { %p112_p3 = scmp.eq.s32.totalorder %s1320_s17, 1  ;;  %p1321_p5 = scmp.ge.s32.totalorder %s1783_s15, 1 }
   0x9   : > { %p1847_p4 = por %p2171_p1, %p40_p0  ;;  %p119_p7 = scmp.lt.s32.totalorder %s1783_s15, 3 }
   0xa   : > { %p1852_p6 = por %p112_p3, %p40_p0  ;;  %s1785_s21 = smov [#allocation5]  }
   0xb   : > { %s2175_s18 = scalar_select %p1847_p4, 1, 0 }
   0xc   : > { %s2176_s19 = scalar_select %p1852_p6, 1, 0 }
   0xd   : > { %p1857_p8 = pnand %p1321_p5, %p119_p7  ;;  %s131_s22 = sshll.u32 %s1785_s21, 4  ;;  %s132_s22 = int_to_ptr.vmem [resolvable:$true] %s131_s22 }
   0xe   : > { %s1786_s24 = smov [#allocation7]   ;;  %s1646_s26 = scalar_lea.vmem %s132_s22, 9216 }
   0xf   : > { %s2177_s20 = scalar_select %p1857_p8, 1, 0 }
  0x10   : > { %p1464_p9 = pneg %p1857_p8  ;;  %s145_s25 = sshll.u32 %s1786_s24, 4  ;;  %s146_s25 = int_to_ptr.vmem [resolvable:$true] %s145_s25 }
  0x11   : > { %p1647_p13 = scmp.ne.s32.totalorder %s132_s22, %s1646_s26  ;;  %p1654_p5 = scmp.lt.s32.totalorder %s132_s22, %s132_s22 }
  0x12   : > { %p1866_p11 = pnand %p1464_p9, %p2171_p1  ;;  %p1655_p7 = scmp.lt.s32.totalorder %s1646_s26, %s1646_s26 }
  0x14   : > { %p1637_p12 = pneg %p1866_p11  ;;  %p1656_p10 = por %p1655_p7, %p1654_p5 }
  0x16   : > { %p1649_p0 = pnand %p1647_p13, %p1637_p12 }
  0x18   : > { %p1650_p3 = pneg %p1649_p0 }
  0x1a   : > { %p1657_p9 = pnand %p1656_p10, %p1650_p3 }
  0x1c   : > { %1660 = shalt.err (!%p1657_p9)
}
  0x1d   : > { %s1787_s27 = smov 256   ;;  %s1788_s28 = smov 16  }
  0x1e   : > { %1467 = dma.hbm_to_vmem [thread:$0]  (!%p1866_p11), %s2168_s1, 9216, %s132_s22, [#allocation6], %s1787_s27, %s1787_s27, %s1788_s28  }
  0x1f   : > { %s1672_s4 = scalar_lea.vmem %s146_s25, 64  ;;  %p1680_p2 = scmp.lt.s32.totalorder %s146_s25, %s146_s25 }
  0x20   : > { %p1673_p1 = scmp.ne.s32.totalorder %s146_s25, %s1672_s4  ;;  %p1681_p6 = scmp.lt.s32.totalorder %s1672_s4, %s1672_s4 }
  0x22   : > { %p1675_p13 = pnand %p1673_p1, %p1637_p12  ;;  %p1682_p5 = por %p1681_p6, %p1680_p2 }
  0x24   : > { %p1676_p0 = pneg %p1675_p13 }
  0x26   : > { %p1683_p10 = pnand %p1682_p5, %p1676_p0 }
  0x28   : > { %1686 = shalt.err (!%p1683_p10)
}
  0x29   : > { %1470 = dma.hbm_to_vmem [thread:$0]  (!%p1866_p11), %s2169_s2, 64, %s146_s25, [#allocation6]  }
  0x2a   : > { %s1889_s7 = sadd.s32 1, %s1783_s15   ;;  %s27_s8 = sadd.s32 1, %s1779_s14 }
  0x2b   : > { %s24_s9 = ssub.s32 %s1783_s15, %s1889_s7  ;;  %p34_p1 = scmp.ne.s32.totalorder %s1779_s14, %s1775_s13 }
  0x2c   : > { %p25_p2 = scmp.eq.s32.totalorder %s24_s9, 0  ;;  %p35_p6 = scmp.eq.s32.totalorder %s1783_s15, 0 }
  0x2d   : > { %p2179_p12 = scmp.eq.s32.totalorder %s1838_s16, 1  ;;  %p1481_p7 = scmp.lt.s32.totalorder %s1783_s15, 2 }
  0x2e   : > { %s1905_s11 = scalar_select %p25_p2, %s1779_s14, %s27_s8  }
  0x2f   : > { %p1899_p3 = por %p2179_p12, %p34_p1  ;;  %p36_p9 = por %p35_p6, %p34_p1 }
  0x30   : > { %s156_s17 = sand.u32 1, %s1779_s14   ;;  %s1426_s22 = sshll.u32 %s1783_s15, 9 }
  0x31   : > { %s2180_s10 = scalar_select %p1899_p3, 1, 0 }
  0x32   : > { %s1325_s21 = sshll.u32 %s156_s17, 5  ;;  %s1912_s25 = scalar_lea.hbm %s2167_s0, %s1426_s22 }
  0x33   : > { %s160_s26 = scalar_lea.vmem [#allocation2], %s1325_s21  ;;  %p1916_p11 = pnand %p1481_p7, %p36_p9 }
  0x34   : > { %s167_s27 = sshll.u32 %s160_s26, 4  ;;  %s1920_s29 = scalar_lea.sflag [#allocation3], %s156_s17  ;;  %s1914_s27 = int_to_ptr.vmem [resolvable:$true] %s167_s27 }
  0x35   : > { %s1687_s30 = scalar_lea.hbm %s1912_s25, 512  ;;  %p1689_p0 = pneg %p1916_p11 }
  0x36   : > { %p1688_p13 = scmp.ne.s32.totalorder %s1912_s25, %s1687_s30  ;;  %s1692_s6 = scalar_lea.hbm %s2167_s0, 1024 }
  0x37   : > { %p1693_p1 = scmp.lt.s32.totalorder %s1912_s25, %s2167_s0  ;;  %p1694_p2 = scmp.lt.s32.totalorder %s1692_s6, %s1687_s30 }
  0x38   : > { %p1690_p5 = pnand %p1689_p0, %p1688_p13 }
  0x39   : > { %p1695_p6 = por %p1694_p2, %p1693_p1 }
  0x3a   : > { %p1691_p10 = pneg %p1690_p5 }
  0x3c   : > { %p1696_p12 = pnand %p1695_p6, %p1691_p10 }
  0x3e   : > { %1699 = shalt.err (!%p1696_p12)
}
  0x3f   : > { %s1700_s17 = scalar_lea.vmem %s1914_s27, 512  ;;  %s1789_s21 = smov [#allocation2]  }
  0x40   : > { %p1701_p7 = scmp.ne.s32.totalorder %s1914_s27, %s1700_s17  ;;  %s1705_s22 = sshll.u32 %s1789_s21, 4  ;;  %s1706_s22 = int_to_ptr.vmem [resolvable:$false] %s1705_s22 }
  0x41   : > { %s1707_s23 = scalar_lea.vmem %s1706_s22, 1024  ;;  %p1708_p5 = scmp.lt.s32.totalorder %s1914_s27, %s1706_s22 }
  0x42   : > { %p1703_p9 = pnand %p1701_p7, %p1689_p0  ;;  %p1709_p3 = scmp.lt.s32.totalorder %s1707_s23, %s1700_s17 }
  0x44   : > { %p1704_p13 = pneg %p1703_p9  ;;  %p1710_p4 = por %p1709_p3, %p1708_p5 }
  0x46   : > { %p1711_p8 = pnand %p1710_p4, %p1704_p13 }
  0x48   : > { %1714 = shalt.err (!%p1711_p8)
}
  0x49   : > { %s1790_s24 = smov 128   ;;  %s1791_s26 = smov 8  }
  0x4a   : > { %1474 = dma.hbm_to_vmem [thread:$0]  (!%p1916_p11), %s1912_s25, 512, %s1914_s27, %s1920_s29, %s1790_s24, %s1790_s24, %s1791_s26  }
  0x4b   : > { %p2182_p0 = scmp.ne.s32.totalorder %s2177_s20, 0 }
  0x4c   : > { %s1944_s30 = sand.u32 (!%p2182_p0), 1, %s1775_s13   ;;  %p2183_p4 = scmp.ne.s32.totalorder (!%p2182_p0), %s2175_s18, 0 }
  0x4d   : > { %179 = sbr.rel (%p2182_p0) target bundleno = 742 (0x2e6), region = 32  ;;  %s1329_s4 = sshll.u32 (!%p2182_p0), %s1944_s30, 5 }
  0x4e   : > { %s182_s5 = scalar_lea.sflag (!%p2182_p0), [#allocation3], %s1944_s30  ;;  %s185_s6 = scalar_lea.vmem (!%p2182_p0), [#allocation2], %s1329_s4 }
  0x52   : > { %1758 = dma.done.wait (%p2183_p4), %s182_s5, 512  }
  0x53   : > { %1760 = vsyncadd (%p2183_p4), %s182_s5, 4294966784  ;;  %p2184_p8 = scmp.eq.s32.totalorder %s1838_s16, 0 }
  0x55   : > { %1762 = dma.done.wait (%p2184_p8), [#allocation6], 9280   ;;  %p2185_p3 = pmov %p2184_p8 }
  0x56   : > { %v223_v0 = vlaneseq  ;;  %v1792_v1 = vmov 0   ;;  %v219_v10 = vld [vmem:[%s185_s6 + $0x10] sm:$0xff]  ;;  %v220_v11 = vld [vmem:[%s185_s6 + $0x18] sm:$0xff]  ;;  %v217_v12 = vld [vmem:[%s185_s6] sm:$0xff]  ;;  %v1793_v13 = vmov 0.0   ;;  %vm244_vm3 = vcmask 261120  }
  0x57   : > { %1764 = vsyncadd (%p2185_p3), [#allocation6], 4294958016  ;;  %510 = vmatprep.mubr.bf16.mxu1 %v1792_v1  ;;  %v1976_v16 = vpack.c.bf16 %v220_v11, %v219_v10  ;;  %v218_v17 = vld [vmem:[%s185_s6 + $0x8] sm:$0xff]  ;;  %v1527_v20 = vld [vmem:[#allocation5 + $0x164] ss:$16 sps:$4 sm:$0xff]   ;;  %vm471_vm5 = vcmask 785408  }
  0x58   : > { %v1957_v2 = vshrl.u32 %v223_v0, 7  ;;  %v1959_v3 = vand.u32 127, %v223_v0  ;;  %v1980_v18 = vpack.c.bf16 %v218_v17, %v217_v12  ;;  %v1529_v21 = vld [vmem:[#allocation5 + $0x160] ss:$16 sps:$4 sm:$0xff]   ;;  %v1530_v23 = vld [vmem:[#allocation5 + $0x144] ss:$16 sps:$4 sm:$0xff]   ;;  %482 = vmatprep.subr.bf16.mxu1 %v1527_v20 }
  0x59   : > { %1436 = vmatprep.subr.bf16.mxu0 %v1976_v16  ;;  %v1535_v26 = vld [vmem:[#allocation5 + $0x16c] ss:$16 sps:$4 sm:$0xff]   ;;  %483 = vmatpush1.bf16.msra.mxu1 %v1529_v21  ;;  %v1532_v27 = vld [vmem:[#allocation5 + $0x140] ss:$16 sps:$4 sm:$0xff]   ;;  %v1536_v29 = vld [vmem:[#allocation5 + $0x124] ss:$16 sps:$4 sm:$0xff]  }
  0x5a   : > { %v1962_v4 = vadd.s32 8, %v1957_v2  ;;  %v230_v5 = vadd.s32 4294967295, %v1957_v2  ;;  %v1966_v6 = vadd.s32 16, %v1957_v2  ;;  %v1969_v7 = vadd.s32 24, %v1957_v2  ;;  %1437 = vmatpush3.bf16.msra.mxu0 %v1976_v16  ;;  %484 = vmatprep.subr.bf16.mxu1 %v1530_v23  ;;  %v1533_v30 = vld [vmem:[#allocation5 + $0x168] ss:$16 sps:$4 sm:$0xff]  }
  0x5b   : > { %1438 = vmatprep.subr.bf16.mxu0 %v1980_v18  ;;  %v1541_v31 = vld [vmem:[#allocation5 + $0x14c] ss:$16 sps:$4 sm:$0xff]   ;;  %v1538_v32 = vld [vmem:[#allocation5 + $0x120] ss:$16 sps:$4 sm:$0xff]   ;;  %v1542_v33 = vld [vmem:[#allocation5 + $0x104] ss:$16 sps:$4 sm:$0xff]  }
  0x5c   : > { %v231_v8 = vadd.s32 4294967295, %v1962_v4  ;;  %vm234_vm0 = vcmp.eq.s32.totalorder %v1959_v3, %v230_v5  ;;  %v232_v9 = vadd.s32 4294967295, %v1966_v6  ;;  %v233_v15 = vadd.s32 4294967295, %v1969_v7  ;;  %v1539_v34 = vld [vmem:[#allocation5 + $0x148] ss:$16 sps:$4 sm:$0xff]   ;;  %s1332_s18 = sshll.u32 %s1944_s30, 7 }
  0x5d   : > { %v238_v14 = vsel %vm234_vm0, 1.0, %v1793_v13  ;;  %485 = vmatpush1.bf16.msra.mxu1 %v1532_v27  ;;  %v1547_v35 = vld [vmem:[#allocation5 + $0x12c] ss:$16 sps:$4 sm:$0xff]   ;;  %v1544_v36 = vld [vmem:[#allocation5 + $0x100] ss:$16 sps:$4 sm:$0xff]   ;;  %v819_v17 = vadd.s32 1, %v1969_v7 }
  0x5e   : > { %vm235_vm1 = vcmp.eq.s32.totalorder %v1959_v3, %v231_v8  ;;  %vm236_vm2 = vcmp.eq.s32.totalorder %v1959_v3, %v232_v9  ;;  %vm237_vm4 = vcmp.eq.s32.totalorder %v1959_v3, %v233_v15  ;;  %1439 = vmatpush3.bf16.msra.mxu0 %v1980_v18  ;;  %486 = vmatprep.subr.bf16.mxu1 %v1536_v29  ;;  %v1548_v37 = vld [vmem:[#allocation5 + $0xe4] ss:$16 sps:$4 sm:$0xff]   ;;  %v1545_v38 = vld [vmem:[#allocation5 + $0x128] ss:$16 sps:$4 sm:$0xff]   ;;  %v1553_v39 = vld [vmem:[#allocation5 + $0x10c] ss:$16 sps:$4 sm:$0xff]  }
  0x5f   : > { %v239_v19 = vsel %vm235_vm1, 1.0, %v1793_v13  ;;  %v240_v24 = vsel %vm236_vm2, 1.0, %v1793_v13  ;;  %v241_v25 = vsel %vm237_vm4, 1.0, %v1793_v13  ;;  %535 = vmatprep.subr.bf16.mxu0 %v1535_v26  ;;  %v1550_v40 = vld [vmem:[#allocation5 + $0xe0] ss:$16 sps:$4 sm:$0xff]   ;;  %v818_v15 = vadd.s32 1, %v1966_v6 }
  0x60   : > { %v242_v22 = vpack.c.bf16 %v239_v19, %v238_v14  ;;  %v243_v28 = vpack.c.bf16 %v241_v25, %v240_v24  ;;  %v1554_v41 = vld [vmem:[#allocation5 + $0xc4] ss:$16 sps:$4 sm:$0xff]   ;;  %v1551_v42 = vld [vmem:[#allocation5 + $0x108] ss:$16 sps:$4 sm:$0xff]   ;;  %v1559_v43 = vld [vmem:[#allocation5 + $0xec] ss:$16 sps:$4 sm:$0xff]   ;;  %vm823_vm7 = vcmp.eq.s32.totalorder %v1959_v3, %v819_v17 }
  0x61   : > { %487 = vmatpush1.bf16.msra.mxu1 %v1538_v32  ;;  %v1556_v44 = vld [vmem:[#allocation5 + $0xc0] ss:$16 sps:$4 sm:$0xff]   ;;  %v1565_v45 = vld [vmem:[#allocation5 + $0xa4] ss:$16 sps:$4 sm:$0xff]   ;;  %v1557_v46 = vld [vmem:[#allocation5 + $0xe8] ss:$16 sps:$4 sm:$0xff]   ;;  %vm822_vm6 = vcmp.eq.s32.totalorder %v1959_v3, %v818_v15 }
  0x62   : > { %1440 = vmatprep.mubr.msk.bf16.mxu0 %vm244_vm3, %v242_v22  ;;  %488 = vmatprep.subr.bf16.mxu1 %v1542_v33  ;;  %v1562_v47 = vld [vmem:[#allocation5 + $0xcc] ss:$16 sps:$4 sm:$0xff]   ;;  %v1560_v48 = vld [vmem:[#allocation5 + $0xc8] ss:$16 sps:$4 sm:$0xff]   ;;  %v1563_v49 = vld [vmem:[#allocation5 + $0xa0] ss:$16 sps:$4 sm:$0xff]  }
  0x63   : > { %1441 = vmatmul.mubr.msk.bf16.vlgmr.msra.gmra.mxu0 %vm244_vm3, %v243_v28  ;;  %v1568_v50 = vld [vmem:[#allocation5 + $0xac] ss:$16 sps:$4 sm:$0xff]   ;;  %v1571_v51 = vld [vmem:[#allocation5 + $0x84] ss:$16 sps:$4 sm:$0xff]   ;;  %v1569_v52 = vld [vmem:[#allocation5 + $0x80] ss:$16 sps:$4 sm:$0xff]  }
  0x64   : > { %536 = vmatpush1.bf16.msra.mxu0 %v1533_v30  ;;  %563 = vmatprep.mubr.bf16.mxu0 %v1792_v1  ;;  %v1577_v53 = vld [vmem:[#allocation5 + $0x64] ss:$16 sps:$4 sm:$0xff]   ;;  %v1566_v54 = vld [vmem:[#allocation5 + $0xa8] ss:$16 sps:$4 sm:$0xff]   ;;  %v1574_v55 = vld [vmem:[#allocation5 + $0x8c] ss:$16 sps:$4 sm:$0xff]  }
  0x65   : > { %537 = vmatprep.subr.bf16.mxu0 %v1541_v31  ;;  %489 = vmatpush1.bf16.msra.mxu1 %v1544_v36  ;;  %v1575_v56 = vld [vmem:[#allocation5 + $0x60] ss:$16 sps:$4 sm:$0xff]   ;;  %v1583_v57 = vld [vmem:[#allocation5 + $0x44] ss:$16 sps:$4 sm:$0xff]   ;;  %v1572_v58 = vld [vmem:[#allocation5 + $0x88] ss:$16 sps:$4 sm:$0xff]  }
  0x66   : > { %490 = vmatprep.subr.bf16.mxu1 %v1548_v37  ;;  %v1580_v59 = vld [vmem:[#allocation5 + $0x6c] ss:$16 sps:$4 sm:$0xff]   ;;  %v1581_v60 = vld [vmem:[#allocation5 + $0x40] ss:$16 sps:$4 sm:$0xff]   ;;  %v1578_v61 = vld [vmem:[#allocation5 + $0x68] ss:$16 sps:$4 sm:$0xff]  }
  0x67   : > { %v1586_v62 = vld [vmem:[#allocation5 + $0x4c] ss:$16 sps:$4 sm:$0xff]   ;;  %v1584_v63 = vld [vmem:[#allocation5 + $0x48] ss:$16 sps:$4 sm:$0xff]   ;;  %v1589_v0 = vld [vmem:[#allocation5 + $0x24] ss:$16 sps:$4 sm:$0xff]  }
  0x68   : > { %538 = vmatpush1.bf16.msra.mxu0 %v1539_v34  ;;  %v1592_v5 = vld [vmem:[#allocation5 + $0x2c] ss:$16 sps:$4 sm:$0xff]   ;;  %v1587_v8 = vld [vmem:[#allocation5 + $0x20] ss:$16 sps:$4 sm:$0xff]   ;;  %v1590_v9 = vld [vmem:[#allocation5 + $0x28] ss:$16 sps:$4 sm:$0xff]  }
  0x69   : > { %539 = vmatprep.subr.bf16.mxu0 %v1547_v35  ;;  %491 = vmatpush1.bf16.msra.mxu1 %v1550_v40  ;;  %v1595_v10 = vld [vmem:[#allocation5 + $0x4] ss:$16 sps:$4 sm:$0xff]   ;;  %v1598_v11 = vld [vmem:[#allocation5 + $0xc] ss:$16 sps:$4 sm:$0xff]   ;;  %v1593_v12 = vld [vmem:[#allocation5] ss:$16 sps:$4 sm:$0xff]  }
  0x6a   : > { %492 = vmatprep.subr.bf16.mxu1 %v1554_v41  ;;  %v1596_v14 = vld [vmem:[#allocation5 + $0x8] ss:$16 sps:$4 sm:$0xff]   ;;  %v826_v19 = vsel %vm822_vm6, 1.0, %v1793_v13  ;;  %v827_v20 = vsel %vm823_vm7, 1.0, %v1793_v13  ;;  %v817_v24 = vadd.s32 1, %v1962_v4  ;;  %v816_v26 = vadd.s32 1, %v1957_v2 }
  0x6b   : > { %v829_v21 = vpack.c.bf16 %v827_v20, %v826_v19  ;;  %v1604_v29 = vld [vmem:[#allocation5 + $0x22c] ss:$16 sps:$4 sm:$0xff]   ;;  %v1599_v30 = vld [vmem:[#allocation5 + $0x220] ss:$16 sps:$4 sm:$0xff]   ;;  %v1608_v33 = vld [vmem:[#allocation5 + $0x208] ss:$16 sps:$4 sm:$0xff]  }
  0x6c   : > { %540 = vmatpush1.bf16.msra.mxu0 %v1545_v38  ;;  %vm820_vm8 = vcmp.eq.s32.totalorder %v1959_v3, %v816_v26  ;;  %vm821_vm9 = vcmp.eq.s32.totalorder %v1959_v3, %v817_v24  ;;  %v1610_v31 = vld [vmem:[#allocation5 + $0x20c] ss:$16 sps:$4 sm:$0xff]   ;;  %v1605_v32 = vld [vmem:[#allocation5 + $0x200] ss:$16 sps:$4 sm:$0xff]   ;;  %v1613_v34 = vld [vmem:[#allocation5 + $0x1e4] ss:$16 sps:$4 sm:$0xff]  }
  0x6d   : > { %541 = vmatprep.subr.bf16.mxu0 %v1553_v39  ;;  %493 = vmatpush1.bf16.msra.mxu1 %v1556_v44  ;;  %v824_v4 = vsel %vm820_vm8, 1.0, %v1793_v13  ;;  %v825_v7 = vsel %vm821_vm9, 1.0, %v1793_v13  ;;  %v1602_v13 = vld [vmem:[#allocation5 + $0x228] ss:$16 sps:$4 sm:$0xff]   ;;  %v1616_v35 = vld [vmem:[#allocation5 + $0x1ec] ss:$16 sps:$4 sm:$0xff]  }
  0x6e   : > { %714 = vmatprep.subr.bf16.mxu1 %v1565_v45  ;;  %v828_v28 = vpack.c.bf16 %v825_v7, %v824_v4  ;;  %v1611_v36 = vld [vmem:[#allocation5 + $0x1e0] ss:$16 sps:$4 sm:$0xff]   ;;  %v1614_v37 = vld [vmem:[#allocation5 + $0x1e8] ss:$16 sps:$4 sm:$0xff]   ;;  %v1619_v38 = vld [vmem:[#allocation5 + $0x1c4] ss:$16 sps:$4 sm:$0xff]  }
  0x6f   : > { %v1622_v39 = vld [vmem:[#allocation5 + $0x1cc] ss:$16 sps:$4 sm:$0xff]   ;;  %v1617_v40 = vld [vmem:[#allocation5 + $0x1c0] ss:$16 sps:$4 sm:$0xff]   ;;  %v1620_v41 = vld [vmem:[#allocation5 + $0x1c8] ss:$16 sps:$4 sm:$0xff]  }
  0x70   : > { %542 = vmatpush1.bf16.msra.mxu0 %v1551_v42  ;;  %1359 = vmatmul.mubr.msk.bf16.vlgmr.msra.gmra.mxu1 %vm471_vm5, %v1980_v18  ;;  %v1625_v42 = vld [vmem:[#allocation5 + $0x1a4] ss:$16 sps:$4 sm:$0xff]   ;;  %v1623_v44 = vld [vmem:[#allocation5 + $0x1a0] ss:$16 sps:$4 sm:$0xff]   ;;  %v1626_v45 = vld [vmem:[#allocation5 + $0x1a8] ss:$16 sps:$4 sm:$0xff]  }
  0x71   : > { %543 = vmatprep.subr.bf16.mxu0 %v1559_v43  ;;  %715 = vmatpush1.bf16.msra.mxu1 %v1563_v49  ;;  %v1628_v43 = vld [vmem:[#allocation5 + $0x1ac] ss:$16 sps:$4 sm:$0xff]   ;;  %v1632_v49 = vld [vmem:[#allocation5 + $0x188] ss:$16 sps:$4 sm:$0xff]   ;;  %s2075_s20 = scalar_lea.vmem [#allocation8], %s1332_s18  ;;  %s1427_s25 = sshll.u32 %s1838_s16, 11 }
  0x72   : > { %520 = vmatprep.mubr.bf16.mxu1 %v1792_v1  ;;  %716 = vmatprep.subr.bf16.mxu1 %v1571_v51  ;;  %s1228_s27 = sshll.u32 %s2075_s20, 4  ;;  %s2116_s16 = scalar_lea.hbm %s2170_s3, %s1427_s25  ;;  %s2118_s27 = int_to_ptr.vmem [resolvable:$true] %s1228_s27 }
  0x73   : > { %s1215_s8 = scalar_lea.sflag [#allocation4], %s1944_s30  ;;  %s1715_s9 = scalar_lea.vmem %s2118_s27, 2048 }
  0x74   : > { %544 = vmatpush1.bf16.msra.mxu0 %v1557_v46  ;;  %v1631_v46 = vld [vmem:[#allocation5 + $0x184] ss:$16 sps:$4 sm:$0xff]   ;;  %p1716_p11 = scmp.ne.s32.totalorder %s2118_s27, %s1715_s9  ;;  %p2186_p10 = scmp.ne.s32.totalorder %s2180_s10, 0 }
  0x75   : > { %545 = vmatprep.subr.bf16.mxu0 %v1562_v47  ;;  %717 = vmatpush1.bf16.msra.mxu1 %v1569_v52  ;;  %v1634_v47 = vld [vmem:[#allocation5 + $0x18c] ss:$16 sps:$4 sm:$0xff]   ;;  %s1794_s17 = smov [#allocation8]  }
  0x76   : > { %718 = vmatprep.subr.bf16.mxu1 %v1577_v53  ;;  %p1717_p1 = pnand %p1716_p11, %p2186_p10  ;;  %s1719_s21 = sshll.u32 %s1794_s17, 4  ;;  %s1720_s21 = int_to_ptr.vmem [resolvable:$false] %s1719_s21 }
  0x77   : > { %s1721_s22 = scalar_lea.vmem %s1720_s21, 4096  ;;  %p1722_p6 = scmp.lt.s32.totalorder %s2118_s27, %s1720_s21 }
  0x78   : > { %546 = vmatpush1.bf16.msra.mxu0 %v1560_v48  ;;  %1360 = vmatmul.mubr.msk.bf16.gmra.mxu1 %vm471_vm5, %v1976_v16  ;;  %v1629_v48 = vld [vmem:[#allocation5 + $0x180] ss:$16 sps:$4 sm:$0xff]   ;;  %p1718_p2 = pneg %p1717_p1  ;;  %p1723_p12 = scmp.lt.s32.totalorder %s1721_s22, %s1715_s9 }
  0x79   : > { %767 = vmatprep.subr.bf16.mxu0 %v1568_v50  ;;  %719 = vmatpush1.bf16.msra.mxu1 %v1575_v56 }
  0x7a   : > { %742 = vmatprep.mubr.bf16.mxu1 %v1792_v1  ;;  %720 = vmatprep.subr.bf16.mxu1 %v1583_v57  ;;  %p1724_p7 = por %p1723_p12, %p1722_p6 }
  0x7b   : > { %1361 = vmatmul.mubr.msk.bf16.vlgmr.msra.gmra.mxu0 %vm471_vm5, %v1980_v18 }
  0x7c   : > { %768 = vmatpush1.bf16.msra.mxu0 %v1566_v54  ;;  %573 = vmatprep.mubr.bf16.mxu0 %v1792_v1  ;;  %p1725_p9 = pnand %p1724_p7, %p1718_p2 }
  0x7d   : > { %769 = vmatprep.subr.bf16.mxu0 %v1574_v55  ;;  %721 = vmatpush1.bf16.msra.mxu1 %v1581_v60 }
  0x7e   : > { %722 = vmatprep.subr.bf16.mxu1 %v1589_v0 }
  0x80   : > { %770 = vmatpush1.bf16.msra.mxu0 %v1572_v58 }
  0x81   : > { %771 = vmatprep.subr.bf16.mxu0 %v1580_v59  ;;  %723 = vmatpush1.bf16.msra.mxu1 %v1587_v8 }
  0x82   : > { %724 = vmatprep.subr.bf16.mxu1 %v1595_v10 }
  0x83   : > { %1362 = vmatmul.mubr.msk.bf16.gmra.mxu0 %vm471_vm5, %v1976_v16 }
  0x84   : > { %772 = vmatpush1.bf16.msra.mxu0 %v1578_v61  ;;  %795 = vmatprep.mubr.bf16.mxu0 %v1792_v1 }
  0x85   : > { %773 = vmatprep.subr.bf16.mxu0 %v1586_v62  ;;  %725 = vmatpush1.bf16.msra.mxu1 %v1593_v12 }
  0x86   : > { %1444 = vmatprep.subr.bf16.mxu1 %v1976_v16 }
  0x88   : > { %774 = vmatpush1.bf16.msra.mxu0 %v1584_v63 }
  0x89   : > { %775 = vmatprep.subr.bf16.mxu0 %v1592_v5 }
  0x8c   : > { %776 = vmatpush1.bf16.msra.mxu0 %v1590_v9 }
  0x8d   : > { %777 = vmatprep.subr.bf16.mxu0 %v1598_v11 }
  0x90   : > { %778 = vmatpush1.bf16.msra.mxu0 %v1596_v14 }
 0x123   : > { %v1442_v22 = vpop.f32.mrf.mxu0 }
 0x125   : > { %v285_v23 = vpop.f32.mrf.mxu0 }
 0x127   : > { %v1443_v25 = vpop.f32.mrf.mxu0 }
 0x128   : > { %v301_v3 = vpack.c.bf16 %v1443_v25, %v1442_v22 }
 0x129   : > { %v288_v27 = vpop.f32.mrf.mxu0 }
 0x12a   : > { %v300_v6 = vpack.c.bf16 %v288_v27, %v285_v23 }
 0x12c   : > { %1387 = vmatmul.mubr.msk.bf16.vlgmr.msra.gmra.mxu1 %vm471_vm5, %v300_v6  ;;  %1389 = vmatmul.mubr.msk.bf16.vlgmr.msra.gmra.mxu0 %vm471_vm5, %v300_v6 }
 0x12d   : > { %1445 = vmatpush3.bf16.msra.mxu1 %v1976_v16  ;;  %752 = vmatprep.mubr.bf16.mxu1 %v1792_v1  ;;  %v1601_v16 = vld [vmem:[#allocation5 + $0x224] ss:$16 sps:$4 sm:$0xff]  }
 0x12e   : > { %805 = vmatprep.mubr.bf16.mxu0 %v1792_v1  ;;  %1446 = vmatprep.subr.bf16.mxu1 %v1980_v18 }
 0x12f   : > { %1042 = vmatprep.subr.bf16.mxu0 %v1601_v16  ;;  %v1172_v16 = vsub.s32 2, %v1957_v2 }
 0x130   : > { %1043 = vmatpush1.bf16.msra.mxu0 %v1599_v30  ;;  %v512_v50 = vpop.f32.mrf.mxu1  ;;  %v1168_v30 = vsub.s32 1, %v1957_v2 }
 0x131   : > { %1447 = vmatpush3.bf16.msra.mxu1 %v1980_v18  ;;  %v1607_v18 = vld [vmem:[#allocation5 + $0x204] ss:$16 sps:$4 sm:$0xff]  }
 0x132   : > { %1095 = vmatprep.subr.bf16.mxu1 %v1604_v29  ;;  %1044 = vmatprep.subr.bf16.mxu0 %v1607_v18  ;;  %v514_v51 = vpop.f32.mrf.mxu1  ;;  %v1160_v29 = vld [vmem:[#allocation7] sm:$0xf] }
 0x134   : > { %1388 = vmatmul.mubr.msk.bf16.gmra.mxu1 %vm471_vm5, %v301_v3  ;;  %1390 = vmatmul.mubr.msk.bf16.gmra.mxu0 %vm471_vm5, %v301_v3  ;;  %v516_v52 = vpop.f32.mrf.mxu1  ;;  %v1164_v3 = vsub.s32 0, %v1957_v2 }
 0x135   : > { %1448 = vmatprep.mubr.msk.bf16.mxu1 %vm244_vm3, %v828_v28  ;;  %1070 = vmatprep.mubr.bf16.mxu0 %v1792_v1 }
 0x136   : > { %1045 = vmatpush1.bf16.msra.mxu0 %v1605_v32  ;;  %v2031_v53 = vpop.f32.mrf.mxu1 }
 0x137   : > { %1046 = vmatprep.subr.bf16.mxu0 %v1613_v34  ;;  %v2066_v34 = vrot.slane %v1160_v29, %v1172_v16 }
 0x138   : > { %v2033_v54 = vpop.f32.mrf.mxu1 }
 0x13a   : > { %1047 = vmatpush1.bf16.msra.mxu0 %v1611_v36  ;;  %v2035_v55 = vpop.f32.mrf.mxu1 }
 0x13b   : > { %1048 = vmatprep.subr.bf16.mxu0 %v1619_v38  ;;  %v565_v17 = vpop.f32.mrf.mxu0 }
 0x13c   : > { %1449 = vmatmul.mubr.msk.bf16.vlgmr.msra.gmra.mxu1 %vm244_vm3, %v829_v21  ;;  %v2037_v56 = vpop.f32.mrf.mxu1 }
 0x13d   : > { %1123 = vmatprep.mubr.bf16.mxu1 %v1792_v1  ;;  %1096 = vmatpush1.bf16.msra.mxu1 %v1602_v13  ;;  %v567_v19 = vpop.f32.mrf.mxu0  ;;  %v1176_v13 = vsub.s32 3, %v1957_v2 }
 0x13e   : > { %1097 = vmatprep.subr.bf16.mxu1 %v1610_v31  ;;  %1049 = vmatpush1.bf16.msra.mxu0 %v1617_v40  ;;  %v528_v57 = vpop.f32.mrf.mxu1 }
 0x13f   : > { %1050 = vmatprep.subr.bf16.mxu0 %v1625_v42  ;;  %v569_v20 = vpop.f32.mrf.mxu0  ;;  %v2070_v42 = vrot.slane %v1160_v29, %v1176_v13 }
 0x141   : > { %1098 = vmatpush1.bf16.msra.mxu1 %v1608_v33  ;;  %v571_v21 = vpop.f32.mrf.mxu0  ;;  %v2064_v33 = vrot.slane %v1160_v29, %v1164_v3 }
 0x142   : > { %1099 = vmatprep.subr.bf16.mxu1 %v1616_v35  ;;  %1051 = vmatpush1.bf16.msra.mxu0 %v1623_v44 }
 0x143   : > { %1052 = vmatprep.subr.bf16.mxu0 %v1631_v46  ;;  %v575_v22 = vpop.f32.mrf.mxu0 }
 0x145   : > { %1100 = vmatpush1.bf16.msra.mxu1 %v1614_v37  ;;  %v577_v23 = vpop.f32.mrf.mxu0 }
 0x146   : > { %1101 = vmatprep.subr.bf16.mxu1 %v1622_v39  ;;  %1053 = vmatpush1.bf16.msra.mxu0 %v1629_v48 }
 0x147   : > { %v2053_v24 = vpop.f32.mrf.mxu0 }
 0x149   : > { %1102 = vmatpush1.bf16.msra.mxu1 %v1620_v41  ;;  %v2055_v25 = vpop.f32.mrf.mxu0  ;;  %v2068_v41 = vrot.slane %v1160_v29, %v1168_v30 }
 0x14a   : > { %1103 = vmatprep.subr.bf16.mxu1 %v1628_v43 }
 0x14d   : > { %1104 = vmatpush1.bf16.msra.mxu1 %v1626_v45 }
 0x14e   : > { %1105 = vmatprep.subr.bf16.mxu1 %v1634_v47 }
 0x151   : > { %1106 = vmatpush1.bf16.msra.mxu1 %v1632_v49 }
 0x1ec   : > { %v744_v58 = vpop.f32.mrf.mxu1  ;;  %v797_v26 = vpop.f32.mrf.mxu0 }
 0x1ed   : > { %v745_v31 = vadd.f32 %v744_v58, %v512_v50  ;;  %v798_v32 = vadd.f32 %v797_v26, %v565_v17 }
 0x1ee   : > { %v746_v59 = vpop.f32.mrf.mxu1  ;;  %v799_v27 = vpop.f32.mrf.mxu0 }
 0x1ef   : > { %v747_v35 = vadd.f32 %v746_v59, %v514_v51  ;;  %v800_v36 = vadd.f32 %v799_v27, %v567_v19 }
 0x1f0   : > { %v748_v60 = vpop.f32.mrf.mxu1  ;;  %v801_v6 = vpop.f32.mrf.mxu0 }
 0x1f1   : > { %v749_v2 = vadd.f32 %v748_v60, %v516_v52  ;;  %v802_v43 = vadd.f32 %v801_v6, %v569_v20 }
 0x1f2   : > { %v750_v61 = vpop.f32.mrf.mxu1 }
 0x1f3   : > { %v751_v50 = vadd.f32 %v750_v61, %v2031_v53 }
 0x1f4   : > { %v2039_v62 = vpop.f32.mrf.mxu1 }
 0x1f5   : > { %v755_v53 = vadd.f32 %v2039_v62, %v2033_v54 }
 0x1f6   : > { %v2041_v63 = vpop.f32.mrf.mxu1 }
 0x1f7   : > { %v757_v17 = vadd.f32 %v2041_v63, %v2035_v55 }
 0x1f8   : > { %v2043_v0 = vpop.f32.mrf.mxu1 }
 0x1f9   : > { %v759_v27 = vadd.f32 %v2043_v0, %v2037_v56 }
 0x1fa   : > { %v760_v5 = vpop.f32.mrf.mxu1 }
 0x1fb   : > { %v2045_v8 = vadd.f32 %v760_v5, %v528_v57 }
 0x1fc   : > { %v1450_v9 = vpop.f32.mrf.mxu1 }
 0x1fe   : > { %v870_v10 = vpop.f32.mrf.mxu1 }
 0x200   : > { %v1451_v11 = vpop.f32.mrf.mxu1 }
 0x201   : > { %v886_v15 = vpack.c.bf16 %v1451_v11, %v1450_v9 }
 0x202   : > { %v873_v12 = vpop.f32.mrf.mxu1 }
 0x203   : > { %v885_v14 = vpack.c.bf16 %v873_v12, %v870_v10 }
 0x205   : > { %1417 = vmatmul.mubr.msk.bf16.vlgmr.msra.gmra.mxu0 %vm471_vm5, %v885_v14  ;;  %1419 = vmatmul.mubr.msk.bf16.vlgmr.msra.gmra.mxu1 %vm471_vm5, %v885_v14 }
 0x206   : > { %1080 = vmatprep.mubr.bf16.mxu0 %v1792_v1  ;;  %1133 = vmatprep.mubr.bf16.mxu1 %v1792_v1  ;;  %v803_v1 = vpop.f32.mrf.mxu0 }
 0x207   : > { %v804_v51 = vadd.f32 %v803_v1, %v571_v21 }
 0x208   : > { %v807_v4 = vpop.f32.mrf.mxu0 }
 0x209   : > { %v808_v61 = vadd.f32 %v807_v4, %v575_v22 }
 0x20a   : > { %v809_v7 = vpop.f32.mrf.mxu0 }
 0x20b   : > { %v810_v19 = vadd.f32 %v809_v7, %v577_v23 }
 0x20c   : > { %v811_v28 = vpop.f32.mrf.mxu0 }
 0x20d   : > { %1418 = vmatmul.mubr.msk.bf16.gmra.mxu0 %vm471_vm5, %v886_v15  ;;  %1420 = vmatmul.mubr.msk.bf16.gmra.mxu1 %vm471_vm5, %v886_v15  ;;  %v812_v6 = vadd.f32 %v811_v28, %v2053_v24 }
 0x20e   : > { %v2061_v18 = vpop.f32.mrf.mxu0 }
 0x20f   : > { %v814_v3 = vadd.f32 %v2061_v18, %v2055_v25 }
 0x2c5   : > { %v1072_v37 = vpop.f32.mrf.mxu0  ;;  %v1125_v38 = vpop.f32.mrf.mxu1 }
 0x2c6   : > { %v1144_v39 = vadd.f32 %v1072_v37, %v745_v31  ;;  %v1146_v40 = vadd.f32 %v1125_v38, %v798_v32 }
 0x2c7   : > { %v1074_v44 = vpop.f32.mrf.mxu0  ;;  %v1127_v45 = vpop.f32.mrf.mxu1 }
 0x2c8   : > { %v1182_v46 = vadd.f32 %v2064_v33, %v1144_v39  ;;  %v1184_v47 = vadd.f32 %v2066_v34, %v1146_v40  ;;  %v1145_v48 = vadd.f32 %v1074_v44, %v747_v35  ;;  %v1147_v49 = vadd.f32 %v1127_v45, %v800_v36 }
 0x2c9   : > { %v1076_v57 = vpop.f32.mrf.mxu0  ;;  %v1129_v58 = vpop.f32.mrf.mxu1 }
 0x2ca   : > { %1198 = vst [vmem:[%s2075_s20] sm:$0xff] %v1182_v46  ;;  %1200 = vst [vmem:[%s2075_s20 + $0x10] sm:$0xff] %v1184_v47  ;;  %v1183_v52 = vadd.f32 %v2068_v41, %v1145_v48  ;;  %v1185_v59 = vadd.f32 %v2070_v42, %v1147_v49  ;;  %v1148_v60 = vadd.f32 %v1076_v57, %v749_v2 }
 0x2cb   : > { %v1150_v5 = vadd.f32 %v1129_v58, %v802_v43  ;;  %v1078_v9 = vpop.f32.mrf.mxu0  ;;  %v1131_v10 = vpop.f32.mrf.mxu1 }
 0x2cc   : > { %1199 = vst [vmem:[%s2075_s20 + $0x8] sm:$0xff] %v1183_v52  ;;  %1201 = vst [vmem:[%s2075_s20 + $0x18] sm:$0xff] %v1185_v59  ;;  %v1186_v11 = vadd.f32 %v2064_v33, %v1148_v60  ;;  %v1149_v14 = vadd.f32 %v1078_v9, %v751_v50  ;;  %v1151_v15 = vadd.f32 %v1131_v10, %v804_v51 }
 0x2cd   : > { %v1188_v12 = vadd.f32 %v2066_v34, %v1150_v5  ;;  %v1082_v20 = vpop.f32.mrf.mxu0  ;;  %v1135_v21 = vpop.f32.mrf.mxu1 }
 0x2ce   : > { %1202 = vst [vmem:[%s2075_s20 + $0x20] sm:$0xff] %v1186_v11  ;;  %v1187_v54 = vadd.f32 %v2068_v41, %v1149_v14  ;;  %v1189_v62 = vadd.f32 %v2070_v42, %v1151_v15  ;;  %v1152_v22 = vadd.f32 %v1082_v20, %v755_v53  ;;  %v1154_v26 = vadd.f32 %v1135_v21, %v808_v61 }
 0x2cf   : > { %1204 = vst [vmem:[%s2075_s20 + $0x30] sm:$0xff] %v1188_v12  ;;  %v1084_v1 = vpop.f32.mrf.mxu0  ;;  %v1137_v55 = vpop.f32.mrf.mxu1 }
 0x2d0   : > { %1203 = vst [vmem:[%s2075_s20 + $0x28] sm:$0xff] %v1187_v54  ;;  %1205 = vst [vmem:[%s2075_s20 + $0x38] sm:$0xff] %v1189_v62  ;;  %v1190_v63 = vadd.f32 %v2064_v33, %v1152_v22  ;;  %v1192_v23 = vadd.f32 %v2066_v34, %v1154_v26  ;;  %v1153_v4 = vadd.f32 %v1084_v1, %v757_v17 }
 0x2d1   : > { %v1155_v7 = vadd.f32 %v1137_v55, %v810_v19  ;;  %v1086_v56 = vpop.f32.mrf.mxu0  ;;  %v1139_v0 = vpop.f32.mrf.mxu1 }
 0x2d2   : > { %1206 = vst [vmem:[%s2075_s20 + $0x40] sm:$0xff] %v1190_v63  ;;  %1208 = vst [vmem:[%s2075_s20 + $0x50] sm:$0xff] %v1192_v23  ;;  %v1191_v24 = vadd.f32 %v2068_v41, %v1153_v4  ;;  %v1156_v16 = vadd.f32 %v1086_v56, %v759_v27  ;;  %v1158_v29 = vadd.f32 %v1139_v0, %v812_v6 }
 0x2d3   : > { %v1193_v28 = vadd.f32 %v2070_v42, %v1155_v7  ;;  %v1088_v30 = vpop.f32.mrf.mxu0  ;;  %v1141_v13 = vpop.f32.mrf.mxu1 }
 0x2d4   : > { %1207 = vst [vmem:[%s2075_s20 + $0x48] sm:$0xff] %v1191_v24  ;;  %v1194_v25 = vadd.f32 %v2064_v33, %v1156_v16  ;;  %v1196_v18 = vadd.f32 %v2066_v34, %v1158_v29  ;;  %v1157_v31 = vadd.f32 %v1088_v30, %v2045_v8  ;;  %v1159_v32 = vadd.f32 %v1141_v13, %v814_v3 }
 0x2d5   : > { %1209 = vst [vmem:[%s2075_s20 + $0x58] sm:$0xff] %v1193_v28 }
 0x2d6   : > { %1210 = vst [vmem:[%s2075_s20 + $0x60] sm:$0xff] %v1194_v25  ;;  %1212 = vst [vmem:[%s2075_s20 + $0x70] sm:$0xff] %v1196_v18  ;;  %v1195_v35 = vadd.f32 %v2068_v41, %v1157_v31  ;;  %v1197_v33 = vadd.f32 %v2070_v42, %v1159_v32 }
 0x2d8   : > { %1211 = vst [vmem:[%s2075_s20 + $0x68] sm:$0xff] %v1195_v35  ;;  %1213 = vst [vmem:[%s2075_s20 + $0x78] sm:$0xff] %v1197_v33 }
 0x2d9   : > { %1728 = shalt.err (!%p1725_p9)
}
 0x2da   : > { %s1729_s23 = scalar_lea.hbm %s2116_s16, 2048  ;;  %s1733_s4 = scalar_lea.hbm %s2170_s3, 4096 }
 0x2db   : > { %p1730_p13 = scmp.ne.s32.totalorder %s2116_s16, %s1729_s23  ;;  %p1734_p4 = scmp.lt.s32.totalorder %s2116_s16, %s2170_s3 }
 0x2dc   : > { %p1735_p8 = scmp.lt.s32.totalorder %s1733_s4, %s1729_s23 }
 0x2dd   : > { %p1731_p5 = pnand %p1730_p13, %p2186_p10 }
 0x2de   : > { %p1736_p3 = por %p1735_p8, %p1734_p4 }
 0x2df   : > { %p1732_p0 = pneg %p1731_p5 }
 0x2e1   : > { %p1737_p11 = pnand %p1736_p3, %p1732_p0 }
 0x2e3   : > { %1740 = shalt.err (!%p1737_p11)
}
 0x2e4   : > { %s1795_s18 = smov 512   ;;  %s1796_s20 = smov 32  }
 0x2e5   : > { %1462 = dma.vmem_to_hbm [thread:$0]  (%p2186_p10), %s2118_s27, 2048, %s2116_s16, %s1215_s8, %s1795_s18, %s1795_s18, %s1796_s20  }
 0x2e6 PF: > { %s1243_s25 = sand.u32 1, %s1771_s12   ;;  %p2187_p1 = scmp.ne.s32.totalorder %s2176_s19, 0 }
 0x2e7   : > { %p2188_p2 = scmp.ge.s32.totalorder %s1783_s15, 2  ;;  %s1244_s28 = scalar_lea.sflag [#allocation4], %s1243_s25 }
 0x2e9   : > { %p1476_p6 = pnand %p2188_p2, %p2187_p1 }
 0x2eb   : > { %p1477_p12 = pneg %p1476_p6 }
 0x2ed   : > { %1766 = dma.done.wait (%p1477_p12), %s1244_s28, 2048  }
 0x2ee   : > { %1768 = vsyncadd (%p1477_p12), %s1244_s28, 4294965248  ;;  %p17_p7 = scmp.ge.s32.totalorder %s1889_s7, 4   ;;  %s2189_s12 = smov %s1775_s13 }
 0x2ef   : > { %s2190_s13 = smov %s1779_s14  ;;  %s2191_s14 = smov %s1905_s11 }
 0x2f0   : > { %s2192_s15 = smov %s1889_s7  ;;  %19 = sbr.rel (!%p17_p7) target bundleno = 6 (0x6), region = 87 }
 0x2f5   :  { %1249 = vsyncpa [#allocation3], 1 }
 0x2f6   :  { %1251 = vsyncpa [#allocation3 + $0x1], 1 }
 0x2f7   :  { %1252 = vsyncpa [#allocation6], 1 }
 0x2f8   :  { %1253 = vsyncpa [#allocation4], 1 }
 0x2f9   :  { %1255 = vsyncpa [#allocation4 + $0x1], 1 }

</bundles_post_ra>
